<compile_context>
chip_gen: v7x
topology: tpu7x:2x2x1
jax: 0.10.0
libtpu: 0.0.40
codegen_flags: <defaults>
</compile_context>

<pallas_src>
import numpy as np
import jax
import jax.numpy as jnp
from jax.experimental import pallas as pl
from jax.experimental.pallas import tpu as pltpu


def make_kernel(k):
    """Same as the PyTorch make_kernel, in numpy (used for the reference path)."""
    k = np.asarray(k, dtype=np.float32)
    if k.ndim == 1:
        k = k[None, :] * k[:, None]
    k = k / k.sum()
    return k


def _build_downsample_kernel(taps, ho_blk, out_cols, halo):
    """Kernel factory. `taps` are the flipped, normalized 1-D FIR taps (Python floats)."""
    K = len(taps)

    def _hpass(ref, a):
        # Horizontal FIR for row-phase `a`: ref[2a+b][u, v, c] == x_padded[2u+a, 2v+b, c].
        # Each slab is loaded once in its input dtype; the f32 upcast is applied to the
        # sliced per-tap operand (not the whole slab).
        slabs = [ref[2 * a + b] for b in range(2)]
        acc = None
        for j in range(K):
            b, dj = j % 2, j // 2
            t = taps[j] * slabs[b][:, dj:dj + out_cols, :].astype(jnp.float32)
            acc = t if acc is None else acc + t
        return acc                                  # (rows, out_cols, CT) f32

    def _vpass(htmp_ref):
        # Vertical FIR over the f32 scratch; di offsets land on the major dim (cheap).
        out = None
        for i in range(K):
            a, di = i % 2, i // 2
            t = taps[i] * htmp_ref[a, di:di + ho_blk]
            out = t if out is None else out + t
        return out                                  # (ho_blk, out_cols, CT) f32

    if halo > 0:
        def kernel(x_ref, xh_ref, o_ref, htmp_ref):
            # x_ref : (4, ho_blk, Wh, CT)  main strip (no overlap between strips)
            # xh_ref: (4, halo,   Wh, CT)  halo rows = first rows of the next strip
            # o_ref : (ho_blk, out_cols, CT) lane-dense output
            # htmp_ref: (2, ho_blk + halo, out_cols, CT) f32 scratch
            for a in range(2):
                htmp_ref[a, :ho_blk] = _hpass(x_ref, a)
                htmp_ref[a, ho_blk:] = _hpass(xh_ref, a)
            o_ref[...] = _vpass(htmp_ref).astype(o_ref.dtype)
    else:
        def kernel(x_ref, o_ref, htmp_ref):
            for a in range(2):
                htmp_ref[a, :] = _hpass(x_ref, a)
            o_ref[...] = _vpass(htmp_ref).astype(o_ref.dtype)

    return kernel


def downsample(x, kernel, factor=2, c_tile=128, vmem_target_bytes=28 << 20):
    """Equivalent of Downsample.forward: upfirdn2d(x, make_kernel(kernel), up=1,
    down=factor, pad=(pad0, pad1)).  `kernel` is the raw 1-D blur kernel, e.g. [1,3,3,1]."""
    assert factor == 2, "polyphase kernel implemented for factor=2 (what Downsample uses)"
    k1 = np.asarray(kernel, dtype=np.float32)
    # TODO(synk): non-separable 2-D FIR kernels (make_kernel with an ndim==2 input)
    # are not handled by this separable fast path.
    assert k1.ndim == 1, "expects the 1-D blur kernel, e.g. [1, 3, 3, 1]"
    k1 = k1 / k1.sum()                   # outer(k1, k1) == make_kernel(kernel)
    kf = k1[::-1].copy()                 # flip -> true convolution, as upfirdn2d
    taps = [float(v) for v in kf]
    K = int(k1.shape[0])
    halo = (K - 1) // 2

    N, C, H, W = x.shape
    p = K - factor
    pad0, pad1 = (p + 1) // 2, p // 2
    Hp, Wp = H + pad0 + pad1, W + pad0 + pad1
    Ho = (Hp - K) // factor + 1
    Wo = (Wp - K) // factor + 1
    Wh = Wo + halo                       # columns needed per polyphase slab

    NC = N * C
    NCp = -(-NC // c_tile) * c_tile      # pad channel axis to the 128-lane grid
    n_ct = NCp // c_tile

    # --- block sizing: full working-set accounting (per review) -------------------
    itemsize = np.dtype(x.dtype).itemsize
    per_row = (2 * 4 * Wh * c_tile * itemsize      # main input block, double-buffered
               + 2 * Wo * c_tile * itemsize        # output block, double-buffered
               + 2 * Wo * c_tile * 4               # f32 htmp scratch (both phases)
               + 3 * Wo * c_tile * 4)              # accumulator / slice-copy headroom
    fixed = (2 * 4 * halo * Wh * c_tile * itemsize  # halo input block, double-buffered
             + 2 * halo * Wo * c_tile * 4)          # halo rows of htmp

    ho_blk = int(min(Ho, max(1, (vmem_target_bytes - fixed) // per_row)))
    if halo > 0:
        ho_blk = max(halo, (ho_blk // halo) * halo)   # halo block index math needs this
    n_hs = -(-Ho // ho_blk)
    # Keep >= 2 grid steps when possible so v7x megacore sharding has work.
    if n_hs * n_ct < 2 and Ho >= 2:
        v = -(-Ho // 2)
        if halo > 0:
            v = -(-v // halo) * halo
        ho_blk = max(1, v)
        n_hs = -(-Ho // ho_blk)

    working_set = ho_blk * per_row + fixed
    # Raise v5e's 16 MiB scoped default, stay under v7x's 64 MiB physical VMEM.
    vmem_limit = int(min(48 << 20, max(32 << 20, int(working_set * 1.4))))

    Hh_arr = n_hs * ho_blk + halo        # polyphase rows: all main strips + last halo
    Hfull, Wfull = 2 * Hh_arr, 2 * Wh

    # --- single layout pass: pad + 2x2 polyphase split + NCHW -> (phase,H,W,NC) ----
    xp = jnp.pad(x, ((0, 0), (0, 0),
                     (pad0, max(0, Hfull - H - pad0)),
                     (pad0, max(0, Wfull - W - pad0))))
    xp = xp[:, :, :Hfull, :Wfull]
    xph = xp.reshape(N, C, Hh_arr, 2, Wh, 2)
    xph = jnp.transpose(xph, (3, 5, 2, 4, 0, 1)).reshape(4, Hh_arr, Wh, NC)
    if NCp != NC:
        xph = jnp.pad(xph, ((0, 0), (0, 0), (0, 0), (0, NCp - NC)))
    # xph[2a+b, u, v, nc] == x_padded[2u+a, 2v+b, nc]

    kernel_fn = _build_downsample_kernel(taps, ho_blk, Wo, halo)

    in_specs = [pl.BlockSpec((4, ho_blk, Wh, c_tile), lambda h, c: (0, h, 0, c))]
    args = [xph]
    if halo > 0:
        hsteps = ho_blk // halo
        # Halo block: `halo` rows starting at element (h+1)*ho_blk of the same array
        # (block index * halo == element offset), so input blocks never overlap and
        # no duplicated copy of the input is ever written to HBM.
        in_specs.append(pl.BlockSpec((4, halo, Wh, c_tile),
                                     lambda h, c, s=hsteps: (0, (h + 1) * s, 0, c)))
        args.append(xph)

    out = pl.pallas_call(
        kernel_fn,
        out_shape=jax.ShapeDtypeStruct((n_hs * ho_blk, Wo, NCp), x.dtype),
        grid=(n_hs, n_ct),
        in_specs=in_specs,
        out_specs=pl.BlockSpec((ho_blk, Wo, c_tile), lambda h, c: (h, 0, c)),
        scratch_shapes=[pltpu.VMEM((2, ho_blk + halo, Wo, c_tile), jnp.float32)],
        compiler_params=pltpu.CompilerParams(
            dimension_semantics=("parallel", "parallel"),
            vmem_limit_bytes=vmem_limit),
    )(*args)

    out = out[:Ho, :, :NC].reshape(Ho, Wo, N, C)
    return jnp.transpose(out, (2, 3, 0, 1))                          # (N, C, Ho, Wo)


def downsample_ref(x, kernel2d, factor=2):
    """Pure-JAX reference of upfirdn2d(up=1, down=factor)."""
    N, C, H, W = x.shape
    Kh, Kw = kernel2d.shape
    p = Kh - factor
    pad0, pad1 = (p + 1) // 2, p // 2
    kf = jnp.asarray(kernel2d[::-1, ::-1].copy(), dtype=jnp.float32)
    xp = jnp.pad(x, ((0, 0), (0, 0), (pad0, pad1), (pad0, pad1)))
    out = jax.lax.conv_general_dilated(
        xp.reshape(N * C, 1, xp.shape[2], xp.shape[3]).astype(jnp.float32),
        kf[None, None],
        window_strides=(factor, factor),
        padding="VALID",
    )
    return out.reshape(N, C, out.shape[2], out.shape[3]).astype(x.dtype)


if __name__ == "__main__":
    key = jax.random.PRNGKey(0)
    k1, k2 = jax.random.split(key)

    # Test 1: canonical StyleGAN2 blur kernel [1, 3, 3, 1].
    x = jax.random.normal(k1, (2, 4, 16, 16), dtype=jnp.float32)
    blur = [1.0, 3.0, 3.0, 1.0]
    y = jax.block_until_ready(downsample(x, blur, factor=2))
    y_ref = downsample_ref(x, make_kernel(blur), factor=2)
    assert y.shape == (2, 4, 8, 8), y.shape
    np.testing.assert_allclose(np.asarray(y), np.asarray(y_ref), rtol=1e-5, atol=1e-5)

    # Test 2: asymmetric kernel locks in the tap-flip / polyphase indexing direction.
    x2 = jax.random.normal(k2, (1, 3, 12, 12), dtype=jnp.float32)
    blur2 = [1.0, 2.0, 3.0, 4.0]
    y2 = jax.block_until_ready(downsample(x2, blur2, factor=2))
    y2_ref = downsample_ref(x2, make_kernel(blur2), factor=2)
    assert y2.shape == (1, 3, 6, 6), y2.shape
    np.testing.assert_allclose(np.asarray(y2), np.asarray(y2_ref), rtol=1e-5, atol=1e-5)

    print("KERNEL_OK")
</pallas_src>

<mosaic_0001>
module attributes {stable_mosaic.version = 11 : i64} {
  func.func @kernel(%arg0: i32, %arg1: i32, %arg2: memref<4x4x9x128xf32, #tpu.memory_space<vmem>>, %arg3: memref<4x1x9x128xf32, #tpu.memory_space<vmem>>, %arg4: memref<4x8x128xf32, #tpu.memory_space<vmem>>, %arg5: memref<2x5x8x128xf32, #tpu.memory_space<vmem>>) attributes {dimension_semantics = [#tpu.dimension_semantics<parallel>, #tpu.dimension_semantics<parallel>], iteration_bounds = array<i64: 2, 1>, scalar_prefetch = 0 : i64, scratch_operands = 1 : i64, tpu.core_type = #tpu.core_type<tc>, window_params = [{transform_indices = @transform_0, window_bounds = array<i64: 4, 4, 9, 128>}, {transform_indices = @transform_1, window_bounds = array<i64: 4, 1, 9, 128>}, {transform_indices = @transform_2, window_bounds = array<i64: 4, 8, 128>}]} {
    %c0 = arith.constant 0 : index
    %c0_0 = arith.constant 0 : index
    %c0_1 = arith.constant 0 : index
    %c0_2 = arith.constant 0 : index
    %0 = vector.load %arg2[%c0, %c0_0, %c0_1, %c0_2] : memref<4x4x9x128xf32, #tpu.memory_space<vmem>>, vector<1x4x9x128xf32>
    %1 = vector.shape_cast %0 : vector<1x4x9x128xf32> to vector<4x9x128xf32>
    %c1 = arith.constant 1 : index
    %c0_3 = arith.constant 0 : index
    %c0_4 = arith.constant 0 : index
    %c0_5 = arith.constant 0 : index
    %2 = vector.load %arg2[%c1, %c0_3, %c0_4, %c0_5] : memref<4x4x9x128xf32, #tpu.memory_space<vmem>>, vector<1x4x9x128xf32>
    %3 = vector.shape_cast %2 : vector<1x4x9x128xf32> to vector<4x9x128xf32>
    %4 = vector.extract_strided_slice %1 {offsets = [0, 0, 0], sizes = [4, 8, 128], strides = [1, 1, 1]} : vector<4x9x128xf32> to vector<4x8x128xf32>
    %cst = arith.constant 1.250000e-01 : f32
    %5 = vector.broadcast %cst : f32 to vector<4x8x128xf32>
    %6 = arith.mulf %5, %4 : vector<4x8x128xf32>
    %7 = vector.extract_strided_slice %3 {offsets = [0, 0, 0], sizes = [4, 8, 128], strides = [1, 1, 1]} : vector<4x9x128xf32> to vector<4x8x128xf32>
    %cst_6 = arith.constant 3.750000e-01 : f32
    %8 = vector.broadcast %cst_6 : f32 to vector<4x8x128xf32>
    %9 = arith.mulf %8, %7 : vector<4x8x128xf32>
    %10 = arith.addf %6, %9 : vector<4x8x128xf32>
    %11 = vector.extract_strided_slice %1 {offsets = [0, 1, 0], sizes = [4, 8, 128], strides = [1, 1, 1]} : vector<4x9x128xf32> to vector<4x8x128xf32>
    %cst_7 = arith.constant 3.750000e-01 : f32
    %12 = vector.broadcast %cst_7 : f32 to vector<4x8x128xf32>
    %13 = arith.mulf %12, %11 : vector<4x8x128xf32>
    %14 = arith.addf %10, %13 : vector<4x8x128xf32>
    %15 = vector.extract_strided_slice %3 {offsets = [0, 1, 0], sizes = [4, 8, 128], strides = [1, 1, 1]} : vector<4x9x128xf32> to vector<4x8x128xf32>
    %cst_8 = arith.constant 1.250000e-01 : f32
    %16 = vector.broadcast %cst_8 : f32 to vector<4x8x128xf32>
    %17 = arith.mulf %16, %15 : vector<4x8x128xf32>
    %18 = arith.addf %14, %17 : vector<4x8x128xf32>
    %c0_9 = arith.constant 0 : index
    %c0_10 = arith.constant 0 : index
    %c0_11 = arith.constant 0 : index
    %c0_12 = arith.constant 0 : index
    %19 = vector.load %arg5[%c0_9, %c0_10, %c0_11, %c0_12] : memref<2x5x8x128xf32, #tpu.memory_space<vmem>>, vector<1x4x8x128xf32>
    %20 = vector.shape_cast %19 : vector<1x4x8x128xf32> to vector<4x8x128xf32>
    %21 = vector.shape_cast %18 : vector<4x8x128xf32> to vector<1x4x8x128xf32>
    tpu.vector_store %arg5[%c0_9, %c0_10, %c0_11, %c0_12], %21 {strides = array<i32>} : memref<2x5x8x128xf32, #tpu.memory_space<vmem>>, vector<1x4x8x128xf32>,
    %c0_13 = arith.constant 0 : index
    %c0_14 = arith.constant 0 : index
    %c0_15 = arith.constant 0 : index
    %c0_16 = arith.constant 0 : index
    %22 = vector.load %arg3[%c0_13, %c0_14, %c0_15, %c0_16] : memref<4x1x9x128xf32, #tpu.memory_space<vmem>>, vector<1x1x9x128xf32>
    %23 = vector.shape_cast %22 : vector<1x1x9x128xf32> to vector<1x9x128xf32>
    %c1_17 = arith.constant 1 : index
    %c0_18 = arith.constant 0 : index
    %c0_19 = arith.constant 0 : index
    %c0_20 = arith.constant 0 : index
    %24 = vector.load %arg3[%c1_17, %c0_18, %c0_19, %c0_20] : memref<4x1x9x128xf32, #tpu.memory_space<vmem>>, vector<1x1x9x128xf32>
    %25 = vector.shape_cast %24 : vector<1x1x9x128xf32> to vector<1x9x128xf32>
    %26 = vector.extract_strided_slice %23 {offsets = [0, 0, 0], sizes = [1, 8, 128], strides = [1, 1, 1]} : vector<1x9x128xf32> to vector<1x8x128xf32>
    %cst_21 = arith.constant 1.250000e-01 : f32
    %27 = vector.broadcast %cst_21 : f32 to vector<1x8x128xf32>
    %28 = arith.mulf %27, %26 : vector<1x8x128xf32>
    %29 = vector.extract_strided_slice %25 {offsets = [0, 0, 0], sizes = [1, 8, 128], strides = [1, 1, 1]} : vector<1x9x128xf32> to vector<1x8x128xf32>
    %cst_22 = arith.constant 3.750000e-01 : f32
    %30 = vector.broadcast %cst_22 : f32 to vector<1x8x128xf32>
    %31 = arith.mulf %30, %29 : vector<1x8x128xf32>
    %32 = arith.addf %28, %31 : vector<1x8x128xf32>
    %33 = vector.extract_strided_slice %23 {offsets = [0, 1, 0], sizes = [1, 8, 128], strides = [1, 1, 1]} : vector<1x9x128xf32> to vector<1x8x128xf32>
    %cst_23 = arith.constant 3.750000e-01 : f32
    %34 = vector.broadcast %cst_23 : f32 to vector<1x8x128xf32>
    %35 = arith.mulf %34, %33 : vector<1x8x128xf32>
    %36 = arith.addf %32, %35 : vector<1x8x128xf32>
    %37 = vector.extract_strided_slice %25 {offsets = [0, 1, 0], sizes = [1, 8, 128], strides = [1, 1, 1]} : vector<1x9x128xf32> to vector<1x8x128xf32>
    %cst_24 = arith.constant 1.250000e-01 : f32
    %38 = vector.broadcast %cst_24 : f32 to vector<1x8x128xf32>
    %39 = arith.mulf %38, %37 : vector<1x8x128xf32>
    %40 = arith.addf %36, %39 : vector<1x8x128xf32>
    %c0_25 = arith.constant 0 : index
    %c4 = arith.constant 4 : index
    %c0_26 = arith.constant 0 : index
    %c0_27 = arith.constant 0 : index
    %41 = vector.load %arg5[%c0_25, %c4, %c0_26, %c0_27] : memref<2x5x8x128xf32, #tpu.memory_space<vmem>>, vector<1x1x8x128xf32>
    %42 = vector.shape_cast %41 : vector<1x1x8x128xf32> to vector<1x8x128xf32>
    %43 = vector.shape_cast %40 : vector<1x8x128xf32> to vector<1x1x8x128xf32>
    tpu.vector_store %arg5[%c0_25, %c4, %c0_26, %c0_27], %43 {strides = array<i32>} : memref<2x5x8x128xf32, #tpu.memory_space<vmem>>, vector<1x1x8x128xf32>,
    %c2 = arith.constant 2 : index
    %c0_28 = arith.constant 0 : index
    %c0_29 = arith.constant 0 : index
    %c0_30 = arith.constant 0 : index
    %44 = vector.load %arg2[%c2, %c0_28, %c0_29, %c0_30] : memref<4x4x9x128xf32, #tpu.memory_space<vmem>>, vector<1x4x9x128xf32>
    %45 = vector.shape_cast %44 : vector<1x4x9x128xf32> to vector<4x9x128xf32>
    %c3 = arith.constant 3 : index
    %c0_31 = arith.constant 0 : index
    %c0_32 = arith.constant 0 : index
    %c0_33 = arith.constant 0 : index
    %46 = vector.load %arg2[%c3, %c0_31, %c0_32, %c0_33] : memref<4x4x9x128xf32, #tpu.memory_space<vmem>>, vector<1x4x9x128xf32>
    %47 = vector.shape_cast %46 : vector<1x4x9x128xf32> to vector<4x9x128xf32>
    %48 = vector.extract_strided_slice %45 {offsets = [0, 0, 0], sizes = [4, 8, 128], strides = [1, 1, 1]} : vector<4x9x128xf32> to vector<4x8x128xf32>
    %cst_34 = arith.constant 1.250000e-01 : f32
    %49 = vector.broadcast %cst_34 : f32 to vector<4x8x128xf32>
    %50 = arith.mulf %49, %48 : vector<4x8x128xf32>
    %51 = vector.extract_strided_slice %47 {offsets = [0, 0, 0], sizes = [4, 8, 128], strides = [1, 1, 1]} : vector<4x9x128xf32> to vector<4x8x128xf32>
    %cst_35 = arith.constant 3.750000e-01 : f32
    %52 = vector.broadcast %cst_35 : f32 to vector<4x8x128xf32>
    %53 = arith.mulf %52, %51 : vector<4x8x128xf32>
    %54 = arith.addf %50, %53 : vector<4x8x128xf32>
    %55 = vector.extract_strided_slice %45 {offsets = [0, 1, 0], sizes = [4, 8, 128], strides = [1, 1, 1]} : vector<4x9x128xf32> to vector<4x8x128xf32>
    %cst_36 = arith.constant 3.750000e-01 : f32
    %56 = vector.broadcast %cst_36 : f32 to vector<4x8x128xf32>
    %57 = arith.mulf %56, %55 : vector<4x8x128xf32>
    %58 = arith.addf %54, %57 : vector<4x8x128xf32>
    %59 = vector.extract_strided_slice %47 {offsets = [0, 1, 0], sizes = [4, 8, 128], strides = [1, 1, 1]} : vector<4x9x128xf32> to vector<4x8x128xf32>
    %cst_37 = arith.constant 1.250000e-01 : f32
    %60 = vector.broadcast %cst_37 : f32 to vector<4x8x128xf32>
    %61 = arith.mulf %60, %59 : vector<4x8x128xf32>
    %62 = arith.addf %58, %61 : vector<4x8x128xf32>
    %c1_38 = arith.constant 1 : index
    %c0_39 = arith.constant 0 : index
    %c0_40 = arith.constant 0 : index
    %c0_41 = arith.constant 0 : index
    %63 = vector.load %arg5[%c1_38, %c0_39, %c0_40, %c0_41] : memref<2x5x8x128xf32, #tpu.memory_space<vmem>>, vector<1x4x8x128xf32>
    %64 = vector.shape_cast %63 : vector<1x4x8x128xf32> to vector<4x8x128xf32>
    %65 = vector.shape_cast %62 : vector<4x8x128xf32> to vector<1x4x8x128xf32>
    tpu.vector_store %arg5[%c1_38, %c0_39, %c0_40, %c0_41], %65 {strides = array<i32>} : memref<2x5x8x128xf32, #tpu.memory_space<vmem>>, vector<1x4x8x128xf32>,
    %c2_42 = arith.constant 2 : index
    %c0_43 = arith.constant 0 : index
    %c0_44 = arith.constant 0 : index
    %c0_45 = arith.constant 0 : index
    %66 = vector.load %arg3[%c2_42, %c0_43, %c0_44, %c0_45] : memref<4x1x9x128xf32, #tpu.memory_space<vmem>>, vector<1x1x9x128xf32>
    %67 = vector.shape_cast %66 : vector<1x1x9x128xf32> to vector<1x9x128xf32>
    %c3_46 = arith.constant 3 : index
    %c0_47 = arith.constant 0 : index
    %c0_48 = arith.constant 0 : index
    %c0_49 = arith.constant 0 : index
    %68 = vector.load %arg3[%c3_46, %c0_47, %c0_48, %c0_49] : memref<4x1x9x128xf32, #tpu.memory_space<vmem>>, vector<1x1x9x128xf32>
    %69 = vector.shape_cast %68 : vector<1x1x9x128xf32> to vector<1x9x128xf32>
    %70 = vector.extract_strided_slice %67 {offsets = [0, 0, 0], sizes = [1, 8, 128], strides = [1, 1, 1]} : vector<1x9x128xf32> to vector<1x8x128xf32>
    %cst_50 = arith.constant 1.250000e-01 : f32
    %71 = vector.broadcast %cst_50 : f32 to vector<1x8x128xf32>
    %72 = arith.mulf %71, %70 : vector<1x8x128xf32>
    %73 = vector.extract_strided_slice %69 {offsets = [0, 0, 0], sizes = [1, 8, 128], strides = [1, 1, 1]} : vector<1x9x128xf32> to vector<1x8x128xf32>
    %cst_51 = arith.constant 3.750000e-01 : f32
    %74 = vector.broadcast %cst_51 : f32 to vector<1x8x128xf32>
    %75 = arith.mulf %74, %73 : vector<1x8x128xf32>
    %76 = arith.addf %72, %75 : vector<1x8x128xf32>
    %77 = vector.extract_strided_slice %67 {offsets = [0, 1, 0], sizes = [1, 8, 128], strides = [1, 1, 1]} : vector<1x9x128xf32> to vector<1x8x128xf32>
    %cst_52 = arith.constant 3.750000e-01 : f32
    %78 = vector.broadcast %cst_52 : f32 to vector<1x8x128xf32>
    %79 = arith.mulf %78, %77 : vector<1x8x128xf32>
    %80 = arith.addf %76, %79 : vector<1x8x128xf32>
    %81 = vector.extract_strided_slice %69 {offsets = [0, 1, 0], sizes = [1, 8, 128], strides = [1, 1, 1]} : vector<1x9x128xf32> to vector<1x8x128xf32>
    %cst_53 = arith.constant 1.250000e-01 : f32
    %82 = vector.broadcast %cst_53 : f32 to vector<1x8x128xf32>
    %83 = arith.mulf %82, %81 : vector<1x8x128xf32>
    %84 = arith.addf %80, %83 : vector<1x8x128xf32>
    %c1_54 = arith.constant 1 : index
    %c4_55 = arith.constant 4 : index
    %c0_56 = arith.constant 0 : index
    %c0_57 = arith.constant 0 : index
    %85 = vector.load %arg5[%c1_54, %c4_55, %c0_56, %c0_57] : memref<2x5x8x128xf32, #tpu.memory_space<vmem>>, vector<1x1x8x128xf32>
    %86 = vector.shape_cast %85 : vector<1x1x8x128xf32> to vector<1x8x128xf32>
    %87 = vector.shape_cast %84 : vector<1x8x128xf32> to vector<1x1x8x128xf32>
    tpu.vector_store %arg5[%c1_54, %c4_55, %c0_56, %c0_57], %87 {strides = array<i32>} : memref<2x5x8x128xf32, #tpu.memory_space<vmem>>, vector<1x1x8x128xf32>,
    %c0_58 = arith.constant 0 : index
    %c0_59 = arith.constant 0 : index
    %c0_60 = arith.constant 0 : index
    %c0_61 = arith.constant 0 : index
    %88 = vector.load %arg5[%c0_58, %c0_59, %c0_60, %c0_61] : memref<2x5x8x128xf32, #tpu.memory_space<vmem>>, vector<1x4x8x128xf32>
    %89 = vector.shape_cast %88 : vector<1x4x8x128xf32> to vector<4x8x128xf32>
    %cst_62 = arith.constant 1.250000e-01 : f32
    %90 = vector.broadcast %cst_62 : f32 to vector<4x8x128xf32>
    %91 = arith.mulf %90, %89 : vector<4x8x128xf32>
    %c1_63 = arith.constant 1 : index
    %c0_64 = arith.constant 0 : index
    %c0_65 = arith.constant 0 : index
    %c0_66 = arith.constant 0 : index
    %92 = vector.load %arg5[%c1_63, %c0_64, %c0_65, %c0_66] : memref<2x5x8x128xf32, #tpu.memory_space<vmem>>, vector<1x4x8x128xf32>
    %93 = vector.shape_cast %92 : vector<1x4x8x128xf32> to vector<4x8x128xf32>
    %cst_67 = arith.constant 3.750000e-01 : f32
    %94 = vector.broadcast %cst_67 : f32 to vector<4x8x128xf32>
    %95 = arith.mulf %94, %93 : vector<4x8x128xf32>
    %96 = arith.addf %91, %95 : vector<4x8x128xf32>
    %c0_68 = arith.constant 0 : index
    %c1_69 = arith.constant 1 : index
    %c0_70 = arith.constant 0 : index
    %c0_71 = arith.constant 0 : index
    %97 = vector.load %arg5[%c0_68, %c1_69, %c0_70, %c0_71] : memref<2x5x8x128xf32, #tpu.memory_space<vmem>>, vector<1x4x8x128xf32>
    %98 = vector.shape_cast %97 : vector<1x4x8x128xf32> to vector<4x8x128xf32>
    %cst_72 = arith.constant 3.750000e-01 : f32
    %99 = vector.broadcast %cst_72 : f32 to vector<4x8x128xf32>
    %100 = arith.mulf %99, %98 : vector<4x8x128xf32>
    %101 = arith.addf %96, %100 : vector<4x8x128xf32>
    %c1_73 = arith.constant 1 : index
    %c1_74 = arith.constant 1 : index
    %c0_75 = arith.constant 0 : index
    %c0_76 = arith.constant 0 : index
    %102 = vector.load %arg5[%c1_73, %c1_74, %c0_75, %c0_76] : memref<2x5x8x128xf32, #tpu.memory_space<vmem>>, vector<1x4x8x128xf32>
    %103 = vector.shape_cast %102 : vector<1x4x8x128xf32> to vector<4x8x128xf32>
    %cst_77 = arith.constant 1.250000e-01 : f32
    %104 = vector.broadcast %cst_77 : f32 to vector<4x8x128xf32>
    %105 = arith.mulf %104, %103 : vector<4x8x128xf32>
    %106 = arith.addf %101, %105 : vector<4x8x128xf32>
    %c0_78 = arith.constant 0 : index
    %c0_79 = arith.constant 0 : index
    %c0_80 = arith.constant 0 : index
    %107 = vector.load %arg4[%c0_78, %c0_79, %c0_80] : memref<4x8x128xf32, #tpu.memory_space<vmem>>, vector<4x8x128xf32>
    tpu.vector_store %arg4[%c0_78, %c0_79, %c0_80], %106 {strides = array<i32>} : memref<4x8x128xf32, #tpu.memory_space<vmem>>, vector<4x8x128xf32>,
    return
  }
  func.func @transform_0(%arg0: i32, %arg1: i32) -> (i32, i32, i32, i32) {
    %c0_i32 = arith.constant 0 : i32
    %c0_i32_0 = arith.constant 0 : i32
    %c0_i32_1 = arith.constant 0 : i32
    return %c0_i32, %arg0, %c0_i32_0, %arg1 : i32, i32, i32, i32
  }
  func.func @transform_1(%arg0: i32, %arg1: i32) -> (i32, i32, i32, i32) {
    %c1_i32 = arith.constant 1 : i32
    %0 = arith.addi %arg0, %c1_i32 : i32
    %c4_i32 = arith.constant 4 : i32
    %1 = arith.muli %0, %c4_i32 : i32
    %c0_i32 = arith.constant 0 : i32
    %c0_i32_0 = arith.constant 0 : i32
    %c0_i32_1 = arith.constant 0 : i32
    return %c0_i32, %1, %c0_i32_0, %arg1 : i32, i32, i32, i32
  }
  func.func @transform_2(%arg0: i32, %arg1: i32) -> (i32, i32, i32) {
    %c0_i32 = arith.constant 0 : i32
    %c0_i32_0 = arith.constant 0 : i32
    return %arg0, %c0_i32, %arg1 : i32, i32, i32
  }
}

</mosaic_0001>

<bundles_post_ra>
// kernel: tpu_custom_call.1
= control target key start
LH: loop header
LB: loop body
LE: loop exit
PB: predicated region body
PF: predicated region fallthrough
CT: control target
= control target key end

     0   :  { %s1742_s0 = inlined_call_operand.vmem [shape: f32[4,9,9,128], index: 0, kind: input, shape index: {}]   ;;  %s1743_s1 = inlined_call_operand.vmem [shape: f32[4,9,9,128], index: 1, kind: input, shape index: {}]   ;;  %s1744_s2 = inlined_call_operand.hbm [shape: f32[8,8,128], index: 2, kind: output, shape index: {}]  }
   0x1   :  { %1745 = sst [smem:[#allocation8_spill]] %s1742_s0 }
   0x2   :  { %7 = vsyncpa [#allocation6], 0 }
   0x3   :  { %9 = vsyncpa [#allocation6 + $0x1], 0  ;;  %s1381_s9 = smov 0   ;;  %s1383_s10 = smov 0  }
   0x4   :  { %s1385_s11 = smov 0   ;;  %s1387_s12 = smov 0  }
   0x5   :  { %s1389_s13 = smov 0   ;;  %s1391_s14 = smov 0  }
   0x6   :  { %s1393_s15 = smov 0   ;;  %s1395_s16 = smov 0  }
   0x7 LB: > { %s992_s17 = sadd.s32 4294967295, %s1345_s16   ;;  %s993_s18 = sadd.s32 4294967294, %s1345_s16   ;;  %s1345_s16 = sphi %s1395_s16, %s15_s16   ;;  %s1341_s15 = sphi %s1393_s15, %s1762_s15   ;;  %s1337_s14 = sphi %s1391_s14, %s1761_s14   ;;  %s1333_s13 = sphi %s1389_s13, %s1760_s13   ;;  %s1329_s12 = sphi %s1387_s12, %s1759_s12   ;;  %s1325_s11 = sphi %s1385_s11, %s1758_s11   ;;  %s1321_s10 = sphi %s1383_s10, %s1757_s10   ;;  %s1317_s9 = sphi %s1381_s9, %s1756_s9  }
   0x8   : > { %s27_s19 = sadd.s32 1, %s1341_s15  ;;  %s36_s20 = sadd.s32 1, %s1333_s13 }
   0x9   : > { %p29_p0 = scmp.ge.s32.totalorder %s27_s19, 2  ;;  %p43_p1 = scmp.ne.s32.totalorder %s1333_s13, %s1329_s12 }
   0xa   : > { %p44_p2 = scmp.eq.s32.totalorder %s1345_s16, 0  ;;  %s1066_s21 = sshll.u32 %s1341_s15, 2 }
   0xb   : > { %s1764_s19 = smov (%p29_p0, %s27_s19), 0  ;;  %s1067_s23 = sadd.s32 4, %s1066_s21 }
   0xc   : > { %p1436_p3 = por %p44_p2, %p43_p1  ;;  %s31_s24 = ssub.s32 %s1341_s15, %s1764_s19 }
   0xd   : > { %s1068_s25 = sshll.u32 %s1764_s19, 2  ;;  %p34_p4 = scmp.eq.s32.totalorder %s31_s24, 0 }
   0xe   : > { %s1069_s26 = sadd.s32 4, %s1068_s25  ;;  %s68_s28 = sadd.s32 1, %s1325_s11 }
   0xf   : > { %s63_s27 = ssub.s32 %s1067_s23, %s1069_s26  ;;  %p75_p6 = scmp.ne.s32.totalorder %s1325_s11, %s1321_s10 }
  0x10   : > { %s1445_s29 = scalar_select %p34_p4, %s1333_s13, %s36_s20  }
  0x11   : > { %p66_p5 = scmp.eq.s32.totalorder %s63_s27, 0  ;;  %p107_p7 = scmp.eq.s32.totalorder %s992_s17, 1 }
  0x12   : > { %p112_p8 = scmp.ne.s32.totalorder %s1329_s12, %s1317_s9  ;;  %p1456_p9 = por %p75_p6, %p44_p2 }
  0x13   : > { %s1452_s30 = scalar_select %p66_p5, %s1325_s11, %s68_s28  }
  0x14   : > { %p1463_p10 = por %p107_p7, %p43_p1  ;;  %p113_p11 = scmp.eq.s32.totalorder %s993_s18, 1 }
  0x15   : > { %p997_p13 = scmp.ge.s32.totalorder %s1345_s16, 2 }
  0x16   : > { %p1467_p12 = por %p113_p11, %p112_p8 }
  0x17   : > { %129 = sbr.rel (%p997_p13) target bundleno = 65 (0x41), region = 16 }
  0x1e   : > { %132 = sbr.rel (!%p1436_p3) target bundleno = 57 (0x39), region = 20  ;;  %s134_s6 = sand.u32 (%p1436_p3), 1, %s1333_s13  }
  0x1f   : > { %s1477_s7 = sshll.u32 (%p1436_p3), %s134_s6, 8  ;;  %s1072_s8 = sshll.u32 (%p1436_p3), %s1341_s15, 6 }
  0x20   : > { %s1750_s0 = sld [smem:[#allocation8_spill]] (%p1436_p3)  ;;  %s136_s21 = scalar_lea.vmem (%p1436_p3), [#allocation3], %s1477_s7  }
  0x21   : > { %s1751_s23 = smov (%p1436_p3), %s136_s21  ;;  %s1493_s24 = smov (%p1436_p3), 0  }
  0x22   : > { %s1495_s25 = smov (%p1436_p3), 0  }
  0x26   : > { %s1483_s20 = scalar_lea.vmem %s1750_s0, %s1072_s8  }
  0x27   : > { %s1752_s22 = smov %s1483_s20 }
  0x28 LB: >> { %v281_v0 = vld [vmem:[%s1353_s22] sm:$0xff]  ;;  %v283_v1 = vld [vmem:[%s1353_s22 + $0x8] sm:$0xff]  ;;  %v285_v2 = vld [vmem:[%s1353_s22 + $0x10] sm:$0xff]  ;;  %s345_s26 = sadd.s32 1, %s1357_s24  ;;  %s275_s25 = sadd.s32 1, %s1361_s25   ;;  %s1361_s25 = sphi %s1495_s25, %s275_s25   ;;  %s1357_s24 = sphi %s1493_s24, %s1755_s24   ;;  %s1353_s22 = sphi %s1752_s22, %s1754_s22   ;;  %s1349_s23 = sphi %s1751_s23, %s1753_s23  }
  0x29   : >> { %282 = vst [vmem:[%s1349_s23] sm:$0xff] %v281_v0  ;;  %284 = vst [vmem:[%s1349_s23 + $0x8] sm:$0xff] %v283_v1  ;;  %v287_v3 = vld [vmem:[%s1353_s22 + $0x18] sm:$0xff]  ;;  %v289_v4 = vld [vmem:[%s1353_s22 + $0x20] sm:$0xff]  ;;  %p346_p0 = scmp.ge.s32.totalorder %s345_s26, 1  ;;  %p274_p1 = scmp.ge.s32.totalorder %s275_s25, 1 }
  0x2a   : >> { %286 = vst [vmem:[%s1349_s23 + $0x10] sm:$0xff] %v285_v2  ;;  %v291_v5 = vld [vmem:[%s1353_s22 + $0x28] sm:$0xff]  ;;  %288 = vst [vmem:[%s1349_s23 + $0x18] sm:$0xff] %v287_v3  ;;  %v293_v6 = vld [vmem:[%s1353_s22 + $0x30] sm:$0xff] }
  0x2b   : >> { %290 = vst [vmem:[%s1349_s23 + $0x20] sm:$0xff] %v289_v4  ;;  %292 = vst [vmem:[%s1349_s23 + $0x28] sm:$0xff] %v291_v5  ;;  %v295_v7 = vld [vmem:[%s1353_s22 + $0x38] sm:$0xff]  ;;  %v297_v8 = vld [vmem:[%s1353_s22 + $0x90] sm:$0xff]  ;;  %s1766_s26 = smov (%p346_p0, %s345_s26), 0 }
  0x2c   : >> { %294 = vst [vmem:[%s1349_s23 + $0x30] sm:$0xff] %v293_v6  ;;  %296 = vst [vmem:[%s1349_s23 + $0x38] sm:$0xff] %v295_v7  ;;  %v299_v9 = vld [vmem:[%s1353_s22 + $0x98] sm:$0xff]  ;;  %v301_v10 = vld [vmem:[%s1353_s22 + $0xa0] sm:$0xff]  ;;  %s1008_s27 = sshll.u32 %s1766_s26, 6  ;;  %s1755_s24 = smov %s1766_s26 }
  0x2d   : >> { %298 = vst [vmem:[%s1349_s23 + $0x40] sm:$0xff] %v297_v8  ;;  %v303_v11 = vld [vmem:[%s1353_s22 + $0xa8] sm:$0xff]  ;;  %300 = vst [vmem:[%s1349_s23 + $0x48] sm:$0xff] %v299_v9  ;;  %v305_v12 = vld [vmem:[%s1353_s22 + $0xb0] sm:$0xff]  ;;  %s1550_s28 = scalar_lea.vmem %s1483_s20, %s1008_s27   ;;  %s351_s6 = scalar_lea.vmem %s136_s21, %s1008_s27 [#allocation3]  }
  0x2e   : >> { %302 = vst [vmem:[%s1349_s23 + $0x50] sm:$0xff] %v301_v10  ;;  %304 = vst [vmem:[%s1349_s23 + $0x58] sm:$0xff] %v303_v11  ;;  %v307_v13 = vld [vmem:[%s1353_s22 + $0xb8] sm:$0xff]  ;;  %v309_v14 = vld [vmem:[%s1353_s22 + $0xc0] sm:$0xff] }
  0x2f   : >> { %306 = vst [vmem:[%s1349_s23 + $0x60] sm:$0xff] %v305_v12  ;;  %308 = vst [vmem:[%s1349_s23 + $0x68] sm:$0xff] %v307_v13  ;;  %v311_v15 = vld [vmem:[%s1353_s22 + $0xc8] sm:$0xff]  ;;  %v313_v16 = vld [vmem:[%s1353_s22 + $0x120] sm:$0xff] }
  0x30   : >> { %310 = vst [vmem:[%s1349_s23 + $0x70] sm:$0xff] %v309_v14  ;;  %v315_v17 = vld [vmem:[%s1353_s22 + $0x128] sm:$0xff]  ;;  %312 = vst [vmem:[%s1349_s23 + $0x78] sm:$0xff] %v311_v15  ;;  %v317_v18 = vld [vmem:[%s1353_s22 + $0x130] sm:$0xff] }
  0x31   : >> { %314 = vst [vmem:[%s1349_s23 + $0x80] sm:$0xff] %v313_v16  ;;  %316 = vst [vmem:[%s1349_s23 + $0x88] sm:$0xff] %v315_v17  ;;  %v319_v19 = vld [vmem:[%s1353_s22 + $0x138] sm:$0xff]  ;;  %v321_v20 = vld [vmem:[%s1353_s22 + $0x140] sm:$0xff] }
  0x32   : >> { %318 = vst [vmem:[%s1349_s23 + $0x90] sm:$0xff] %v317_v18  ;;  %320 = vst [vmem:[%s1349_s23 + $0x98] sm:$0xff] %v319_v19  ;;  %v323_v21 = vld [vmem:[%s1353_s22 + $0x148] sm:$0xff]  ;;  %v325_v22 = vld [vmem:[%s1353_s22 + $0x150] sm:$0xff]  ;;  %277 = sbr.rel (!%p274_p1) target bundleno = 40 (0x28), region = 185 }
  0x33   : >> { %322 = vst [vmem:[%s1349_s23 + $0xa0] sm:$0xff] %v321_v20  ;;  %v327_v23 = vld [vmem:[%s1353_s22 + $0x158] sm:$0xff]  ;;  %324 = vst [vmem:[%s1349_s23 + $0xa8] sm:$0xff] %v323_v21  ;;  %v329_v24 = vld [vmem:[%s1353_s22 + $0x1b0] sm:$0xff] }
  0x34   : >> { %326 = vst [vmem:[%s1349_s23 + $0xb0] sm:$0xff] %v325_v22  ;;  %328 = vst [vmem:[%s1349_s23 + $0xb8] sm:$0xff] %v327_v23  ;;  %v331_v25 = vld [vmem:[%s1353_s22 + $0x1b8] sm:$0xff]  ;;  %v333_v26 = vld [vmem:[%s1353_s22 + $0x1c0] sm:$0xff] }
  0x35   : >> { %330 = vst [vmem:[%s1349_s23 + $0xc0] sm:$0xff] %v329_v24  ;;  %332 = vst [vmem:[%s1349_s23 + $0xc8] sm:$0xff] %v331_v25  ;;  %v335_v27 = vld [vmem:[%s1353_s22 + $0x1c8] sm:$0xff]  ;;  %v337_v28 = vld [vmem:[%s1353_s22 + $0x1d0] sm:$0xff] }
  0x36   : >> { %334 = vst [vmem:[%s1349_s23 + $0xd0] sm:$0xff] %v333_v26  ;;  %v339_v29 = vld [vmem:[%s1353_s22 + $0x1d8] sm:$0xff]  ;;  %336 = vst [vmem:[%s1349_s23 + $0xd8] sm:$0xff] %v335_v27  ;;  %v341_v30 = vld [vmem:[%s1353_s22 + $0x1e0] sm:$0xff] }
  0x37   : >> { %338 = vst [vmem:[%s1349_s23 + $0xe0] sm:$0xff] %v337_v28  ;;  %340 = vst [vmem:[%s1349_s23 + $0xe8] sm:$0xff] %v339_v29  ;;  %v343_v31 = vld [vmem:[%s1353_s22 + $0x1e8] sm:$0xff]  ;;  %s1754_s22 = smov %s1550_s28 }
  0x38   : >> { %342 = vst [vmem:[%s1349_s23 + $0xf0] sm:$0xff] %v341_v30  ;;  %344 = vst [vmem:[%s1349_s23 + $0xf8] sm:$0xff] %v343_v31  ;;  %s1753_s23 = smov %s351_s6 }
  0x39 PF: > { %388 = sbr.rel (!%p1456_p9) target bundleno = 65 (0x41), region = 72  ;;  %s390_s8 = sand.u32 (%p1456_p9), 1, %s1325_s11  }
  0x3a   : > { %s1075_s17 = sshll.u32 (%p1456_p9), %s1341_s15, 6  ;;  %s1016_s18 = sshll.u32 (%p1456_p9), %s390_s8, 6 }
  0x3b   : > { %s902_s6 = scalar_lea.vmem (%p1456_p9), %s1743_s1, %s1075_s17  ;;  %s392_s26 = scalar_lea.vmem (%p1456_p9), [#allocation4], %s1016_s18 }
  0x3c   : > { %v1019_v32 = vld [vmem:[%s902_s6 + $0x40] sm:$0xff] (%p1456_p9)  ;;  %v1020_v33 = vld [vmem:[%s902_s6 + $0x48] sm:$0xff] (%p1456_p9)  ;;  %v1021_v34 = vld [vmem:[%s902_s6 + $0xd0] sm:$0xff] (%p1456_p9) }
  0x3d   : > { %441 = vst [vmem:[%s392_s26] sm:$0xff] (%p1456_p9), %v1019_v32  ;;  %443 = vst [vmem:[%s392_s26 + $0x8] sm:$0xff] (%p1456_p9), %v1020_v33  ;;  %v1022_v35 = vld [vmem:[%s902_s6 + $0xd8] sm:$0xff] (%p1456_p9)  ;;  %v1023_v36 = vld [vmem:[%s902_s6 + $0x160] sm:$0xff] (%p1456_p9) }
  0x3e   : > { %445 = vst [vmem:[%s392_s26 + $0x10] sm:$0xff] (%p1456_p9), %v1021_v34  ;;  %v1024_v37 = vld [vmem:[%s902_s6 + $0x168] sm:$0xff] (%p1456_p9)  ;;  %447 = vst [vmem:[%s392_s26 + $0x18] sm:$0xff] (%p1456_p9), %v1022_v35  ;;  %v1025_v38 = vld [vmem:[%s902_s6 + $0x1f0] sm:$0xff] (%p1456_p9) }
  0x3f   : > { %449 = vst [vmem:[%s392_s26 + $0x20] sm:$0xff] (%p1456_p9), %v1023_v36  ;;  %451 = vst [vmem:[%s392_s26 + $0x28] sm:$0xff] (%p1456_p9), %v1024_v37  ;;  %v1026_v39 = vld [vmem:[%s902_s6 + $0x1f8] sm:$0xff] (%p1456_p9) }
  0x40   : > { %453 = vst [vmem:[%s392_s26 + $0x30] sm:$0xff] %v1025_v38  ;;  %455 = vst [vmem:[%s392_s26 + $0x38] sm:$0xff] %v1026_v39 }
  0x41 PF: > { %p1027_p2 = scmp.ge.s32.totalorder %s1345_s16, 1  ;;  %p460_p3 = scmp.lt.s32.totalorder %s1345_s16, 3 }
  0x43   : > { %p461_p4 = pnand %p1027_p2, %p460_p3 }
  0x44   : > { %s1600_s0 = sand.u32 (!%p461_p4), 1, %s1329_s12   ;;  %vm553_vm0 = vcmask (!%p461_p4), 1046528   ;;  %s474_s21 = sand.u32 (!%p461_p4), 1, %s1321_s10  }
  0x45   : > { %464 = sbr.rel (%p461_p4) target bundleno = 139 (0x8b), region = 110  ;;  %s1028_s3 = sshll.u32 (!%p461_p4), %s1600_s0, 8 }
  0x46   : > { %s1603_s7 = scalar_lea.vmem (!%p461_p4), [#allocation3], %s1028_s3  ;;  %s1030_s20 = sshll.u32 (!%p461_p4), %s1600_s0, 5 }
  0x47   : > { %v508_v40 = vld [vmem:[%s1603_s7] sm:$0xff] (!%p461_p4)  ;;  %v509_v41 = vld [vmem:[%s1603_s7 + $0x8] sm:$0x1] (!%p461_p4)  ;;  %v510_v42 = vld [vmem:[%s1603_s7 + $0x10] sm:$0xff] (!%p461_p4)  ;;  %s1646_s10 = sshll.u32 (!%p461_p4), %s474_s21, 6  ;;  %s1653_s23 = scalar_lea.vmem (!%p461_p4), [#allocation5], %s1030_s20 }
  0x48   : > { %v511_v43 = vld [vmem:[%s1603_s7 + $0x18] sm:$0x1] (!%p461_p4)  ;;  %v1031_v44 = vld [vmem:[%s1603_s7 + $0x40] sm:$0xff] (!%p461_p4)  ;;  %v1032_v45 = vld [vmem:[%s1603_s7 + $0x48] sm:$0x1] (!%p461_p4)  ;;  %v525_v46 = vmul.f32 (!%p461_p4), 0.125, %v508_v40 }
  0x49   : > { %v1033_v47 = vld [vmem:[%s1603_s7 + $0x50] sm:$0xff] (!%p461_p4)  ;;  %v526_v48 = vmul.f32 (!%p461_p4), 0.125, %v510_v42  ;;  %v529_v49 = vmul.f32 (!%p461_p4), 0.375, %v1031_v44  ;;  %v537_v50 = vmul.f32 (!%p461_p4), 0.375, %v508_v40  ;;  %v1034_v51 = vld [vmem:[%s1603_s7 + $0x58] sm:$0x1] (!%p461_p4) }
  0x4a   : > { %v530_v52 = vmul.f32 (!%p461_p4), 0.375, %v1033_v47  ;;  %v538_v53 = vmul.f32 (!%p461_p4), 0.375, %v509_v41  ;;  %v539_v54 = vmul.f32 (!%p461_p4), 0.375, %v510_v42  ;;  %v540_v55 = vmul.f32 (!%p461_p4), 0.375, %v511_v43  ;;  %v1041_v60 = vld [vmem:[%s1603_s7 + $0x80] sm:$0xff] (!%p461_p4)  ;;  %v1043_v61 = vld [vmem:[%s1603_s7 + $0x90] sm:$0xff] (!%p461_p4) }
  0x4b   : > { %v533_v56 = vadd.f32 (!%p461_p4), %v529_v49, %v525_v46  ;;  %v554_v57 = vrot.slane (!%p461_p4), %v537_v50, 1  ;;  %v574_v58 = vmul.f32 (!%p461_p4), 0.125, %v1031_v44  ;;  %v575_v59 = vmul.f32 (!%p461_p4), 0.125, %v1032_v45  ;;  %v1049_v6 = vld [vmem:[%s1603_s7 + $0xc0] sm:$0xff] (!%p461_p4)  ;;  %v1051_v7 = vld [vmem:[%s1603_s7 + $0xd0] sm:$0xff] (!%p461_p4)  ;;  %s1660_s22 = scalar_lea.vmem (!%p461_p4), [#allocation4], %s1646_s10 }
  0x4c   : > { %v534_v62 = vadd.f32 %v530_v52, %v526_v48  ;;  %v555_v63 = vrot.slane %v538_v53, 1  ;;  %v557_v0 = vrot.slane %v539_v54, 1  ;;  %v558_v1 = vrot.slane %v540_v55, 1  ;;  %v1042_v10 = vld [vmem:[%s1603_s7 + $0x88] sm:$0x1]  ;;  %v512_v40 = vld [vmem:[%s1603_s7 + $0x20] sm:$0xff] }
  0x4d   : > { %v576_v2 = vmul.f32 0.125, %v1033_v47  ;;  %v577_v3 = vmul.f32 0.125, %v1034_v51  ;;  %v590_v4 = vrot.slane %v574_v58, 1  ;;  %v591_v5 = vrot.slane %v575_v59, 1  ;;  %v1044_v11 = vld [vmem:[%s1603_s7 + $0x98] sm:$0x1] }
  0x4e   : > { %v556_v8 = vsel %vm553_vm0, %v554_v57, %v555_v63  ;;  %v559_v9 = vsel %vm553_vm0, %v557_v0, %v558_v1  ;;  %v660_v12 = vmul.f32 0.125, %v1041_v60  ;;  %v661_v13 = vmul.f32 0.125, %v1043_v61  ;;  %v1050_v19 = vld [vmem:[%s1603_s7 + $0xc8] sm:$0x1]  ;;  %v1052_v24 = vld [vmem:[%s1603_s7 + $0xd8] sm:$0x1] }
  0x4f   : > { %v570_v14 = vadd.f32 %v556_v8, %v533_v56  ;;  %v571_v15 = vadd.f32 %v559_v9, %v534_v62  ;;  %v592_v16 = vsel %vm553_vm0, %v590_v4, %v591_v5  ;;  %v593_v17 = vrot.slane %v576_v2, 1  ;;  %v1035_v41 = vld [vmem:[%s1603_s7 + $0x60] sm:$0xff]  ;;  %v513_v46 = vld [vmem:[%s1603_s7 + $0x28] sm:$0x1]  ;;  %s843_s24 = sshll.u32 %s1653_s23, 4  ;;  %s1076_s25 = sshll.u32 %s1337_s14, 9  ;;  %s1681_s24 = int_to_ptr.vmem [resolvable:$true] %s843_s24 }
  0x50   : > { %v594_v18 = vrot.slane %v577_v3, 1  ;;  %v664_v20 = vmul.f32 0.375, %v1049_v6  ;;  %v665_v21 = vmul.f32 0.375, %v1051_v7  ;;  %v672_v22 = vmul.f32 0.375, %v1041_v60  ;;  %v1036_v51 = vld [vmem:[%s1603_s7 + $0x68] sm:$0x1]  ;;  %s1686_s17 = scalar_lea.hbm %s1744_s2, %s1076_s25 }
  0x51   : > { %v606_v23 = vadd.f32 %v592_v16, %v570_v14  ;;  %v673_v25 = vmul.f32 0.375, %v1042_v10  ;;  %v674_v26 = vmul.f32 0.375, %v1043_v61  ;;  %v675_v27 = vmul.f32 0.375, %v1044_v11  ;;  %v1045_v60 = vld [vmem:[%s1603_s7 + $0xa0] sm:$0xff]  ;;  %v1046_v2 = vld [vmem:[%s1603_s7 + $0xa8] sm:$0x1] }
  0x52   : > { %v595_v28 = vsel %vm553_vm0, %v593_v17, %v594_v18  ;;  %v668_v29 = vadd.f32 %v664_v20, %v660_v12  ;;  %v669_v30 = vadd.f32 %v665_v21, %v661_v13  ;;  %v688_v31 = vrot.slane %v672_v22, 1  ;;  %v1053_v61 = vld [vmem:[%s1603_s7 + $0xe0] sm:$0xff]  ;;  %v1054_v9 = vld [vmem:[%s1603_s7 + $0xe8] sm:$0x1]  ;;  %v514_v20 = vld [vmem:[%s1603_s7 + $0x30] sm:$0xff]  ;;  %s829_s18 = scalar_lea.sflag [#allocation6], %s1600_s0 }
  0x53   : > { %v607_v32 = vadd.f32 %v595_v28, %v571_v15  ;;  %v689_v33 = vrot.slane %v673_v25, 1  ;;  %v691_v34 = vrot.slane %v674_v26, 1  ;;  %v692_v35 = vrot.slane %v675_v27, 1  ;;  %s1214_s27 = scalar_lea.vmem %s1681_s24, 512  ;;  %s1363_s14 = smov [#allocation5]  }
  0x54   : > { %v708_v36 = vmul.f32 0.125, %v1049_v6  ;;  %v709_v37 = vmul.f32 0.125, %v1050_v19  ;;  %v710_v38 = vmul.f32 0.125, %v1051_v7  ;;  %v711_v39 = vmul.f32 0.125, %v1052_v24  ;;  %p1215_p5 = scmp.ne.s32.totalorder %s1681_s24, %s1214_s27  ;;  %s1218_s6 = sshll.u32 %s1363_s14, 4  ;;  %s1219_s6 = int_to_ptr.vmem [resolvable:$false] %s1218_s6 }
  0x55   : > { %v690_v42 = vsel %vm553_vm0, %v688_v31, %v689_v33  ;;  %v693_v43 = vsel %vm553_vm0, %v691_v34, %v692_v35  ;;  %v782_v44 = vmul.f32 0.125, %v606_v23  ;;  %v803_v45 = vmul.f32 0.375, %v607_v32  ;;  %v1038_v35 = vld [vmem:[%s1603_s7 + $0x78] sm:$0x1]  ;;  %s1220_s26 = scalar_lea.vmem %s1219_s6, 1024  ;;  %p1221_p8 = scmp.lt.s32.totalorder %s1681_s24, %s1219_s6 }
  0x56   : > { %v704_v47 = vadd.f32 %v690_v42, %v668_v29  ;;  %v705_v48 = vadd.f32 %v693_v43, %v669_v30  ;;  %v724_v49 = vrot.slane %v708_v36, 1  ;;  %v725_v50 = vrot.slane %v709_v37, 1  ;;  %v515_v29 = vld [vmem:[%s1603_s7 + $0x38] sm:$0x1]  ;;  %v1037_v30 = vld [vmem:[%s1603_s7 + $0x70] sm:$0xff]  ;;  %p1216_p6 = pnand %p1215_p5, %p1463_p10  ;;  %p1222_p9 = scmp.lt.s32.totalorder %s1220_s26, %s1214_s27 }
  0x57   : > { %v727_v52 = vrot.slane %v710_v38, 1  ;;  %v728_v53 = vrot.slane %v711_v39, 1  ;;  %v527_v54 = vmul.f32 0.125, %v512_v40  ;;  %v531_v55 = vmul.f32 0.375, %v1035_v41 }
  0x58   : > { %v726_v56 = vsel %vm553_vm0, %v724_v49, %v725_v50  ;;  %v541_v57 = vmul.f32 0.375, %v512_v40  ;;  %v542_v58 = vmul.f32 0.375, %v513_v46  ;;  %v578_v59 = vmul.f32 0.125, %v1035_v41  ;;  %v1047_v41 = vld [vmem:[%s1603_s7 + $0xb0] sm:$0xff]  ;;  %v1048_v50 = vld [vmem:[%s1603_s7 + $0xb8] sm:$0x1]  ;;  %p1217_p7 = pneg %p1216_p6  ;;  %p1223_p11 = por %p1222_p9, %p1221_p8 }
  0x59   : > { %v729_v62 = vsel %vm553_vm0, %v727_v52, %v728_v53  ;;  %v740_v63 = vadd.f32 %v726_v56, %v704_v47  ;;  %v535_v0 = vadd.f32 %v531_v55, %v527_v54  ;;  %v579_v1 = vmul.f32 0.125, %v1036_v51 }
  0x5a   : > { %v741_v3 = vadd.f32 %v729_v62, %v705_v48  ;;  %v560_v4 = vrot.slane %v541_v57, 1  ;;  %v561_v5 = vrot.slane %v542_v58, 1  ;;  %v596_v6 = vrot.slane %v578_v59, 1  ;;  %v1056_v58 = vld [vmem:[%s1603_s7 + $0xf8] sm:$0x1]  ;;  %p1224_p0 = pnand %p1223_p11, %p1217_p7 }
  0x5b   : > { %v790_v7 = vmul.f32 0.375, %v740_v63  ;;  %v597_v8 = vrot.slane %v579_v1, 1  ;;  %v662_v10 = vmul.f32 0.125, %v1045_v60  ;;  %v666_v11 = vmul.f32 0.375, %v1053_v61 }
  0x5c   : > { %v816_v12 = vmul.f32 0.125, %v741_v3  ;;  %v562_v13 = vsel %vm553_vm0, %v560_v4, %v561_v5  ;;  %v676_v14 = vmul.f32 0.375, %v1045_v60  ;;  %v677_v15 = vmul.f32 0.375, %v1046_v2  ;;  %v1039_v5 = vld [vmem:[%s1660_s22 + $0x10] sm:$0xff] }
  0x5d   : > { %v794_v16 = vadd.f32 %v790_v7, %v782_v44  ;;  %v572_v17 = vadd.f32 %v562_v13, %v535_v0  ;;  %v598_v18 = vsel %vm553_vm0, %v596_v6, %v597_v8  ;;  %v670_v19 = vadd.f32 %v666_v11, %v662_v10  ;;  %v614_v0 = vld [vmem:[%s1660_s22] sm:$0xff]  ;;  %v615_v10 = vld [vmem:[%s1660_s22 + $0x8] sm:$0x1] }
  0x5e   : > { %v694_v21 = vrot.slane %v676_v14, 1  ;;  %v695_v22 = vrot.slane %v677_v15, 1  ;;  %v712_v23 = vmul.f32 0.125, %v1053_v61  ;;  %v713_v24 = vmul.f32 0.125, %v1054_v9 }
  0x5f   : > { %v807_v25 = vadd.f32 %v803_v45, %v794_v16  ;;  %v608_v26 = vadd.f32 %v598_v18, %v572_v17  ;;  %v783_v27 = vmul.f32 0.125, %v607_v32  ;;  %v791_v28 = vmul.f32 0.375, %v741_v3  ;;  %v1055_v45 = vld [vmem:[%s1603_s7 + $0xf0] sm:$0xff]  ;;  %v1040_v17 = vld [vmem:[%s1660_s22 + $0x18] sm:$0x1] }
  0x60   : > { %v696_v31 = vsel %vm553_vm0, %v694_v21, %v695_v22  ;;  %v730_v33 = vrot.slane %v712_v23, 1  ;;  %v731_v34 = vrot.slane %v713_v24, 1  ;;  %v528_v36 = vmul.f32 0.125, %v514_v20  ;;  %v1057_v24 = vld [vmem:[%s1660_s22 + $0x20] sm:$0xff] }
  0x61   : > { %v820_v37 = vadd.f32 %v816_v12, %v807_v25  ;;  %v706_v38 = vadd.f32 %v696_v31, %v670_v19  ;;  %v795_v39 = vadd.f32 %v791_v28, %v783_v27  ;;  %v804_v40 = vmul.f32 0.375, %v608_v26  ;;  %v1059_v25 = vld [vmem:[%s1660_s22 + $0x30] sm:$0xff] }
  0x62   : > { %v732_v32 = vsel %vm553_vm0, %v730_v33, %v731_v34  ;;  %v532_v42 = vmul.f32 0.375, %v1037_v30  ;;  %v543_v43 = vmul.f32 0.375, %v514_v20  ;;  %v544_v44 = vmul.f32 0.375, %v515_v29 }
  0x63   : > { %824 = vst [vmem:[%s1653_s23] sm:$0xff] %v820_v37  ;;  %v742_v46 = vadd.f32 %v732_v32, %v706_v38  ;;  %v808_v47 = vadd.f32 %v804_v40, %v795_v39  ;;  %v580_v48 = vmul.f32 0.125, %v1037_v30  ;;  %v581_v49 = vmul.f32 0.125, %v1038_v35  ;;  %v1058_v30 = vld [vmem:[%s1660_s22 + $0x28] sm:$0x1]  ;;  %v1060_v37 = vld [vmem:[%s1660_s22 + $0x38] sm:$0x1] }
  0x64   : > { %v536_v51 = vadd.f32 %v532_v42, %v528_v36  ;;  %v563_v52 = vrot.slane %v543_v43, 1  ;;  %v564_v53 = vrot.slane %v544_v44, 1  ;;  %v663_v54 = vmul.f32 0.125, %v1047_v41 }
  0x65   : > { %v817_v55 = vmul.f32 0.125, %v742_v46  ;;  %v599_v56 = vrot.slane %v580_v48, 1  ;;  %v600_v57 = vrot.slane %v581_v49, 1  ;;  %v667_v59 = vmul.f32 0.375, %v1055_v45 }
  0x66   : > { %v565_v60 = vsel %vm553_vm0, %v563_v52, %v564_v53  ;;  %v678_v61 = vmul.f32 0.375, %v1047_v41  ;;  %v679_v62 = vmul.f32 0.375, %v1048_v50  ;;  %v714_v63 = vmul.f32 0.125, %v1055_v45 }
  0x67   : > { %v821_v1 = vadd.f32 %v817_v55, %v808_v47  ;;  %v573_v2 = vadd.f32 %v565_v60, %v536_v51  ;;  %v601_v3 = vsel %vm553_vm0, %v599_v56, %v600_v57  ;;  %v671_v4 = vadd.f32 %v667_v59, %v663_v54 }
  0x68   : > { %v697_v6 = vrot.slane %v678_v61, 1  ;;  %v698_v7 = vrot.slane %v679_v62, 1  ;;  %v715_v8 = vmul.f32 0.125, %v1056_v58  ;;  %v733_v9 = vrot.slane %v714_v63, 1 }
  0x69   : > { %825 = vst [vmem:[%s1653_s23 + $0x8] sm:$0xff] %v821_v1  ;;  %v609_v11 = vadd.f32 %v601_v3, %v573_v2  ;;  %v784_v12 = vmul.f32 0.125, %v608_v26  ;;  %v792_v13 = vmul.f32 0.375, %v742_v46  ;;  %v619_v14 = vmul.f32 0.125, %v614_v0 }
  0x6a   : > { %v699_v15 = vsel %vm553_vm0, %v697_v6, %v698_v7  ;;  %v734_v16 = vrot.slane %v715_v8, 1  ;;  %v620_v18 = vmul.f32 0.375, %v1039_v5  ;;  %v622_v19 = vmul.f32 0.375, %v614_v0 }
  0x6b   : > { %v707_v20 = vadd.f32 %v699_v15, %v671_v4  ;;  %v796_v21 = vadd.f32 %v792_v13, %v784_v12  ;;  %v805_v22 = vmul.f32 0.375, %v609_v11  ;;  %v623_v23 = vmul.f32 0.375, %v615_v10 }
  0x6c   : > { %v735_v27 = vsel %vm553_vm0, %v733_v9, %v734_v16  ;;  %v621_v28 = vadd.f32 %v620_v18, %v619_v14  ;;  %v626_v26 = vrot.slane %v622_v19, 1  ;;  %v631_v29 = vmul.f32 0.125, %v1039_v5 }
  0x6d   : > { %v743_v31 = vadd.f32 %v735_v27, %v707_v20  ;;  %v809_v33 = vadd.f32 %v805_v22, %v796_v21  ;;  %v627_v34 = vrot.slane %v623_v23, 1  ;;  %v632_v35 = vmul.f32 0.125, %v1040_v17 }
  0x6e   : > { %v635_v36 = vrot.slane %v631_v29, 1  ;;  %v755_v38 = vmul.f32 0.125, %v1057_v24  ;;  %v756_v39 = vmul.f32 0.375, %v1059_v25  ;;  %v758_v40 = vmul.f32 0.375, %v1057_v24 }
  0x6f   : > { %v818_v41 = vmul.f32 0.125, %v743_v31  ;;  %v628_v32 = vsel %vm553_vm0, %v626_v26, %v627_v34  ;;  %v636_v42 = vrot.slane %v632_v35, 1  ;;  %v759_v43 = vmul.f32 0.375, %v1058_v30 }
  0x70   : > { %v630_v44 = vadd.f32 %v628_v32, %v621_v28  ;;  %v757_v45 = vadd.f32 %v756_v39, %v755_v38  ;;  %v762_v46 = vrot.slane %v758_v40, 1  ;;  %v767_v47 = vmul.f32 0.125, %v1059_v25 }
  0x71   : > { %v822_v48 = vadd.f32 %v818_v41, %v809_v33  ;;  %v637_v49 = vsel %vm553_vm0, %v635_v36, %v636_v42  ;;  %v763_v50 = vrot.slane %v759_v43, 1  ;;  %v768_v51 = vmul.f32 0.125, %v1060_v37 }
  0x72   : > { %v639_v52 = vadd.f32 %v637_v49, %v630_v44  ;;  %v771_v53 = vrot.slane %v767_v47, 1  ;;  %v785_v54 = vmul.f32 0.125, %v609_v11  ;;  %v793_v55 = vmul.f32 0.375, %v743_v31 }
  0x73   : > { %826 = vst [vmem:[%s1653_s23 + $0x10] sm:$0xff] %v822_v48  ;;  %v764_v56 = vsel %vm553_vm0, %v762_v46, %v763_v50  ;;  %v772_v57 = vrot.slane %v768_v51, 1 }
  0x74   : > { %v766_v58 = vadd.f32 %v764_v56, %v757_v45  ;;  %v797_v59 = vadd.f32 %v793_v55, %v785_v54  ;;  %v806_v60 = vmul.f32 0.375, %v639_v52 }
  0x75   : > { %v773_v61 = vsel %vm553_vm0, %v771_v53, %v772_v57 }
  0x76   : > { %v775_v62 = vadd.f32 %v773_v61, %v766_v58  ;;  %v810_v63 = vadd.f32 %v806_v60, %v797_v59 }
  0x78   : > { %v819_v0 = vmul.f32 0.125, %v775_v62 }
  0x7a   : > { %v823_v1 = vadd.f32 %v819_v0, %v810_v63 }
  0x7c   : > { %827 = vst [vmem:[%s1653_s23 + $0x18] sm:$0xff] %v823_v1 }
  0x7d   : > { %1227 = shalt.err (!%p1224_p0)
}
  0x7e   : > { %s1228_s3 = scalar_lea.hbm %s1686_s17, 512  ;;  %s1232_s21 = scalar_lea.hbm %s1744_s2, 1024 }
  0x7f   : > { %p1229_p1 = scmp.ne.s32.totalorder %s1686_s17, %s1228_s3  ;;  %p1233_p4 = scmp.lt.u32.totalorder %s1686_s17, %s1744_s2 }
  0x80   : > { %p1234_p5 = scmp.lt.u32.totalorder %s1232_s21, %s1228_s3  ;;  %p1236_p7 = scmp.lt.u32.totalorder %s1228_s3, %s1686_s17 }
  0x81   : > { %p1230_p2 = pnand %p1229_p1, %p1463_p10 }
  0x82   : > { %p1235_p6 = por %p1234_p5, %p1233_p4 }
  0x83   : > { %p1231_p3 = pneg %p1230_p2 }
  0x84   : > { %p1237_p8 = por %p1236_p7, %p1235_p6 }
  0x86   : > { %p1238_p9 = pnand %p1237_p8, %p1231_p3 }
  0x88   : > { %1241 = shalt.err (!%p1238_p9)
}
  0x89   : > { %s1364_s22 = smov 128   ;;  %s1365_s25 = smov 8  }
  0x8a   : > { %1077 = dma.vmem_to_hbm [thread:$0]  (%p1463_p10), %s1681_s24, 512, %s1686_s17, %s829_s18, %s1364_s22, %s1364_s22, %s1365_s25  }
  0x8b PF: > { %s858_s28 = sand.u32 1, %s1317_s9   ;;  %p1080_p11 = pnand %p997_p13, %p1467_p12 }
  0x8c   : > { %s859_s8 = scalar_lea.sflag [#allocation6], %s858_s28 }
  0x8d   : > { %1308 = dma.done.wait (!%p1080_p11), %s859_s8, 512  }
  0x8e   : > { %1310 = vsyncadd (!%p1080_p11), %s859_s8, 4294966784  ;;  %s15_s16 = sadd.s32 1, %s1345_s16   ;;  %s1756_s9 = smov %s1329_s12 }
  0x8f   : > { %p12_p0 = scmp.ge.s32.totalorder %s15_s16, 4   ;;  %s1757_s10 = smov %s1325_s11 }
  0x90   : > { %s1758_s11 = smov %s1452_s30  ;;  %s1759_s12 = smov %s1333_s13 }
  0x91   : > { %s1760_s13 = smov %s1445_s29  ;;  %s1761_s14 = smov %s1341_s15 }
  0x92   : > { %s1762_s15 = smov %s1764_s19  ;;  %14 = sbr.rel (!%p12_p0) target bundleno = 7 (0x7), region = 207 }
  0x99   :  { %864 = vsyncpa [#allocation6], 1 }
  0x9a   :  { %866 = vsyncpa [#allocation6 + $0x1], 1 }

</bundles_post_ra>
